<compile_context>
chip_gen: v6e
topology: v6e:2x2x1
jax: 0.10.0
libtpu: 0.0.40
codegen_flags: <defaults>
</compile_context>

<pallas_src>
import functools

import jax
import jax.numpy as jnp
from jax.experimental import pallas as pl
from jax.experimental.pallas import tpu as pltpu


# ---------------------------------------------------------------------------
# Kernel 1: K/V projections (channel-major in, channel-major out, no transpose).
# ---------------------------------------------------------------------------
def _kv_proj_kernel(k_ref, v_ref, wk_ref, wv_ref, kp_ref, vp_ref):
    """k_ref:(1,Ck,TN) v_ref:(1,Cv,TN) f32; w*_ref:[Cq, Cin] f32.
    Outputs: (1,Cq,TN) f32 channel-major (lane-dense stores)."""
    kp_ref[0] = jnp.dot(wk_ref[...], k_ref[0],
                        preferred_element_type=jnp.float32)      # [Cq, TN]
    vp_ref[0] = jnp.dot(wv_ref[...], v_ref[0],
                        preferred_element_type=jnp.float32)      # [Cq, TN]


# ---------------------------------------------------------------------------
# Kernel 2: fused Q-projection + flash attention + output projection.
# ---------------------------------------------------------------------------
def _flash_mha_kernel(q_ref, k_ref, v_ref, wq_ref, wp_ref, bp_ref, o_ref,
                      qp_sc, m_sc, l_sc, acc_sc, *, num_heads, head_dim):
    """Channel-major tiles:
       q_ref:(1,Cq,TQ) raw input f32, k_ref/v_ref:(1,Cq,TK) projected f32.
       wq_ref:(Cq,Cq) f32 (softmax scale folded in), wp_ref:(Cq,Cq) [out,in],
       bp_ref:(Cq,1) f32.  o_ref:(1,Cq,TQ) channel-major (lane-dense store).
       Scratch: qp_sc:(Cq,TQ), m_sc/l_sc:(H,1,TQ), acc_sc:(H,D,TQ) f32."""
    ki = pl.program_id(2)
    h, d = num_heads, head_dim
    tq = qp_sc.shape[-1]
    tk = k_ref.shape[-1]

    @pl.when(ki == 0)
    def _init():
        # Project the (resident) q tile exactly once per q-tile.
        qp_sc[...] = jnp.dot(wq_ref[...], q_ref[0],
                             preferred_element_type=jnp.float32)  # [Cq, TQ]
        m_sc[...] = jnp.full(m_sc.shape, -jnp.inf, m_sc.dtype)
        l_sc[...] = jnp.zeros(l_sc.shape, l_sc.dtype)
        acc_sc[...] = jnp.zeros(acc_sc.shape, acc_sc.dtype)

    # Leading-dim splits only (sequence stays on lanes): free reshapes.
    qh = qp_sc[...].reshape(h, d, tq)                 # [H, D, TQ]
    kh = k_ref[0].reshape(h, d, tk)                   # [H, D, TK]
    vh = v_ref[0].reshape(h, d, tk)                   # [H, D, TK]

    # scores[h, tk, tq] = sum_d kh[h,d,tk] * qh[h,d,tq]   (all heads, one push)
    s = jax.lax.dot_general(kh, qh, (((1,), (1,)), ((0,), (0,))),
                            preferred_element_type=jnp.float32)   # [H, TK, TQ]

    m_prev = m_sc[...]                                            # [H, 1, TQ]
    m_new = jnp.maximum(m_prev, jnp.max(s, axis=1, keepdims=True))
    alpha = jnp.exp(m_prev - m_new)                               # [H, 1, TQ]
    p = jnp.exp(s - m_new)                                        # [H, TK, TQ]
    l_sc[...] = alpha * l_sc[...] + jnp.sum(p, axis=1, keepdims=True)
    # pv[h, d, tq] = sum_tk vh[h,d,tk] * p[h,tk,tq]
    pv = jax.lax.dot_general(vh, p, (((2,), (1,)), ((0,), (0,))),
                             preferred_element_type=jnp.float32)  # [H, D, TQ]
    acc_sc[...] = alpha * acc_sc[...] + pv
    m_sc[...] = m_new

    @pl.when(ki == pl.num_programs(2) - 1)
    def _finalize():
        c_q = wp_ref.shape[0]
        inv_l = 1.0 / l_sc[...]                       # exact; once per q-tile
        o_cm = (acc_sc[...] * inv_l).reshape(c_q, tq)  # [Cq, TQ] (free merge)
        # out[co, tq] = sum_ci wp[co, ci] * o_cm[ci, tq]  (single big matmul,
        # directly channel-major -> no transpose, wp in native [out,in] layout)
        out = jax.lax.dot_general(wp_ref[...], o_cm, (((1,), (0,)), ((), ())),
                                  preferred_element_type=jnp.float32)
        o_ref[0] = (out + bp_ref[...]).astype(o_ref.dtype)        # [Cq, TQ]


# ---------------------------------------------------------------------------
# Wrapper
# ---------------------------------------------------------------------------
def _pick_tile(n, forced, prefs):
    if forced is not None:
        assert n % forced == 0, "tile must divide the sequence length"
        return forced
    for cand in prefs:
        if cand <= n and n % cand == 0:
            return cand
    # TODO(synk): pad/mask path for sequence lengths not divisible by 128.
    return n


def multi_head_attention(q_nchw, k_nchw, v_nchw, params, *, num_heads=4,
                         qk_scale=None, row_tile=None, q_tile=None,
                         kv_tile=None):
    """q/k/v in NCHW, params in nn.Linear [out, in] layout.  Returns NCHW."""
    b, c_q, h_sp, w_sp = q_nchw.shape
    _, c_k, _, _ = k_nchw.shape
    _, c_v, _, _ = v_nchw.shape
    n = h_sp * w_sp
    assert c_q % num_heads == 0, "q_dim must be divisible by num_heads"
    head_dim = c_q // num_heads
    scale = qk_scale if qk_scale is not None else head_dim ** (-0.5)

    tn = _pick_tile(n, row_tile, (512, 256, 128))
    tq = _pick_tile(n, q_tile, (256, 128))
    # Collapse the kv axis when the (double-buffered) projected K/V blocks fit
    # a conservative VMEM budget: no K/V re-fetch across q-tiles and no
    # per-step online-softmax rescale work.
    if kv_tile is None and 4 * n * c_q * 4 <= 8 * 1024 * 1024:
        tk = n
    else:
        tk = _pick_tile(n, kv_tile, (512, 256, 128))

    # NCHW -> channel-major [B, C, N]: pure reshape, no HBM transpose pass.
    q_cn = q_nchw.reshape(b, c_q, n)
    k_cn = k_nchw.reshape(b, c_k, n)
    v_cn = v_nchw.reshape(b, c_v, n)

    # f32 MXU operands (f32 accumulation); softmax scale folded into wq.
    wq = (params["wq"] * scale).astype(jnp.float32)    # [Cq, Cq]  ([out, in])
    wk = params["wk"].astype(jnp.float32)              # [Cq, Ck]
    wv = params["wv"].astype(jnp.float32)              # [Cq, Cv]
    wp = params["wp"].astype(jnp.float32)              # [Cq, Cq]  ([out, in])
    bp = params["bp"].reshape(c_q, 1).astype(jnp.float32)

    # Conservative scoped-VMEM request; tile budgets above keep usage well
    # under this on v5e/v6e (128 MiB) and v7x (64 MiB per TC).
    vmem_limit = 32 * 1024 * 1024

    # ---- Phase 1: project K/V once (channel-major out, lane-dense stores). --
    kp, vp = pl.pallas_call(
        _kv_proj_kernel,
        out_shape=(
            jax.ShapeDtypeStruct((b, c_q, n), jnp.float32),
            jax.ShapeDtypeStruct((b, c_q, n), jnp.float32),
        ),
        grid_spec=pltpu.PrefetchScalarGridSpec(
            num_scalar_prefetch=0,
            grid=(b, n // tn),
            in_specs=[
                pl.BlockSpec((1, c_k, tn), lambda i, j: (i, 0, j)),
                pl.BlockSpec((1, c_v, tn), lambda i, j: (i, 0, j)),
                pl.BlockSpec((c_q, c_k), lambda i, j: (0, 0)),
                pl.BlockSpec((c_q, c_v), lambda i, j: (0, 0)),
            ],
            out_specs=[
                pl.BlockSpec((1, c_q, tn), lambda i, j: (i, 0, j)),
                pl.BlockSpec((1, c_q, tn), lambda i, j: (i, 0, j)),
            ],
        ),
        compiler_params=pltpu.CompilerParams(
            dimension_semantics=("parallel", "parallel"),
            vmem_limit_bytes=vmem_limit),
    )(k_cn, v_cn, wk, wv)

    # ---- Phase 2: fused Q-projection + flash attention + output projection. --
    attn_kernel = functools.partial(_flash_mha_kernel,
                                    num_heads=num_heads, head_dim=head_dim)
    out_cn = pl.pallas_call(
        attn_kernel,
        out_shape=jax.ShapeDtypeStruct((b, c_q, n), q_nchw.dtype),
        grid_spec=pltpu.PrefetchScalarGridSpec(
            num_scalar_prefetch=0,
            grid=(b, n // tq, n // tk),
            in_specs=[
                pl.BlockSpec((1, c_q, tq), lambda bi, qi, ki: (bi, 0, qi)),
                pl.BlockSpec((1, c_q, tk), lambda bi, qi, ki: (bi, 0, ki)),
                pl.BlockSpec((1, c_q, tk), lambda bi, qi, ki: (bi, 0, ki)),
                pl.BlockSpec((c_q, c_q), lambda bi, qi, ki: (0, 0)),
                pl.BlockSpec((c_q, c_q), lambda bi, qi, ki: (0, 0)),
                pl.BlockSpec((c_q, 1), lambda bi, qi, ki: (0, 0)),
            ],
            out_specs=pl.BlockSpec((1, c_q, tq),
                                   lambda bi, qi, ki: (bi, 0, qi)),
            scratch_shapes=[
                pltpu.VMEM((c_q, tq), jnp.float32),                  # proj q
                pltpu.VMEM((num_heads, 1, tq), jnp.float32),         # running max
                pltpu.VMEM((num_heads, 1, tq), jnp.float32),         # running sum
                pltpu.VMEM((num_heads, head_dim, tq), jnp.float32),  # acc
            ],
        ),
        compiler_params=pltpu.CompilerParams(
            dimension_semantics=("parallel", "parallel", "arbitrary"),
            vmem_limit_bytes=vmem_limit),
    )(q_cn, kp, vp, wq, wp, bp)

    # Channel-major [B, Cq, N] -> NCHW is a free reshape.
    return out_cn.reshape(b, c_q, h_sp, w_sp)


def init_params(key, q_dim, k_dim, v_dim, dtype=jnp.float32):
    """Deterministic synthetic weights with nn.Linear shapes ([out, in])."""
    k1, k2, k3, k4, k5 = jax.random.split(key, 5)
    s = 0.2
    return {
        "wq": jax.random.normal(k1, (q_dim, q_dim), dtype) * s,
        "wk": jax.random.normal(k2, (q_dim, k_dim), dtype) * s,
        "wv": jax.random.normal(k3, (q_dim, v_dim), dtype) * s,
        "wp": jax.random.normal(k4, (q_dim, q_dim), dtype) * s,
        "bp": jax.random.normal(k5, (q_dim,), dtype) * s,
    }


def _reference_mha(q, k, v, p, num_heads=4, qk_scale=None):
    """Pure-JAX f32 reference matching the PyTorch forward."""
    b, cq, h, w = q.shape
    n = h * w
    hd = cq // num_heads
    scale = qk_scale if qk_scale is not None else hd ** (-0.5)
    qs = jnp.transpose(q.reshape(b, cq, n), (0, 2, 1)) @ p["wq"].T
    ks = jnp.transpose(k.reshape(b, k.shape[1], n), (0, 2, 1)) @ p["wk"].T
    vs = jnp.transpose(v.reshape(b, v.shape[1], n), (0, 2, 1)) @ p["wv"].T
    qs = qs.reshape(b, n, num_heads, hd).transpose(0, 2, 1, 3)
    ks = ks.reshape(b, n, num_heads, hd).transpose(0, 2, 1, 3)
    vs = vs.reshape(b, n, num_heads, hd).transpose(0, 2, 1, 3)
    attn = jax.nn.softmax(qs @ ks.transpose(0, 1, 3, 2) * scale, axis=-1)
    x = (attn @ vs).transpose(0, 2, 1, 3).reshape(b, n, cq)
    x = x @ p["wp"].T + p["bp"]
    return jnp.transpose(x, (0, 2, 1)).reshape(b, cq, h, w)


if __name__ == "__main__":
    # Small shapes consistent with the module: q_dim divisible by num_heads=4.
    B, Cq, Ck, Cv, H, W = 2, 32, 16, 24, 16, 16   # N = 256 tokens
    key = jax.random.PRNGKey(0)
    key_q, key_k, key_v, key_p = jax.random.split(key, 4)

    q = jax.random.normal(key_q, (B, Cq, H, W), jnp.float32)
    k = jax.random.normal(key_k, (B, Ck, H, W), jnp.float32)
    v = jax.random.normal(key_v, (B, Cv, H, W), jnp.float32)
    params = init_params(key_p, Cq, Ck, Cv)

    expected = _reference_mha(q, k, v, params, num_heads=4)

    # Default tiling: kv axis collapses (tk = N), single-pass softmax.
    out = multi_head_attention(q, k, v, params, num_heads=4)
    jax.block_until_ready(out)
    max_err = float(jnp.max(jnp.abs(out - expected)))
    # Tolerance covers default-precision (bf16-pass) MXU f32 matmuls on HW.
    assert jnp.allclose(out, expected, atol=3e-2, rtol=3e-2), max_err

    # Forced 128-wide tiles: exercises the multi-step online-softmax path.
    out_tiled = multi_head_attention(q, k, v, params, num_heads=4,
                                     row_tile=128, q_tile=128, kv_tile=128)
    jax.block_until_ready(out_tiled)
    max_err_tiled = float(jnp.max(jnp.abs(out_tiled - expected)))
    assert jnp.allclose(out_tiled, expected, atol=3e-2, rtol=3e-2), max_err_tiled

    print("KERNEL_OK")
</pallas_src>

<mosaic_0001>
module attributes {stable_mosaic.version = 11 : i64} {
  func.func @_kv_proj_kernel(%arg0: i32, %arg1: i32, %arg2: memref<1x16x256xf32, #tpu.memory_space<vmem>>, %arg3: memref<1x24x256xf32, #tpu.memory_space<vmem>>, %arg4: memref<32x16xf32, #tpu.memory_space<vmem>>, %arg5: memref<32x24xf32, #tpu.memory_space<vmem>>, %arg6: memref<1x32x256xf32, #tpu.memory_space<vmem>>, %arg7: memref<1x32x256xf32, #tpu.memory_space<vmem>>) attributes {dimension_semantics = [#tpu.dimension_semantics<parallel>, #tpu.dimension_semantics<parallel>], iteration_bounds = array<i64: 2, 1>, scalar_prefetch = 0 : i64, scratch_operands = 0 : i64, tpu.core_type = #tpu.core_type<tc>, window_params = [{transform_indices = @transform_0, window_bounds = array<i64: 1, 16, 256>}, {transform_indices = @transform_1, window_bounds = array<i64: 1, 24, 256>}, {pipeline_mode = #tpu.pipeline_mode<synchronous>, transform_indices = @transform_2, window_bounds = array<i64: 32, 16>}, {pipeline_mode = #tpu.pipeline_mode<synchronous>, transform_indices = @transform_3, window_bounds = array<i64: 32, 24>}, {transform_indices = @transform_4, window_bounds = array<i64: 1, 32, 256>}, {transform_indices = @transform_5, window_bounds = array<i64: 1, 32, 256>}]} {
    %c0 = arith.constant 0 : index
    %c0_0 = arith.constant 0 : index
    %0 = vector.load %arg4[%c0, %c0_0] : memref<32x16xf32, #tpu.memory_space<vmem>>, vector<32x16xf32>
    %c0_1 = arith.constant 0 : index
    %c0_2 = arith.constant 0 : index
    %c0_3 = arith.constant 0 : index
    %1 = vector.load %arg2[%c0_1, %c0_2, %c0_3] : memref<1x16x256xf32, #tpu.memory_space<vmem>>, vector<1x16x256xf32>
    %2 = vector.shape_cast %1 : vector<1x16x256xf32> to vector<16x256xf32>
    %cst = arith.constant dense<0.000000e+00> : vector<32x256xf32>
    %3 = tpu.matmul %0, %2, %cst {dimension_numbers = #tpu.dot_dimension_numbers<[1], [0], [0], [1], [0, 0, 1, 1], [], []>} : vector<32x16xf32>, vector<16x256xf32>, vector<32x256xf32> -> vector<32x256xf32>
    %c0_4 = arith.constant 0 : index
    %c0_5 = arith.constant 0 : index
    %c0_6 = arith.constant 0 : index
    %4 = vector.load %arg6[%c0_4, %c0_5, %c0_6] : memref<1x32x256xf32, #tpu.memory_space<vmem>>, vector<1x32x256xf32>
    %5 = vector.shape_cast %4 : vector<1x32x256xf32> to vector<32x256xf32>
    %6 = vector.shape_cast %3 : vector<32x256xf32> to vector<1x32x256xf32>
    tpu.vector_store %arg6[%c0_4, %c0_5, %c0_6], %6 {strides = array<i32>} : memref<1x32x256xf32, #tpu.memory_space<vmem>>, vector<1x32x256xf32>,
    %c0_7 = arith.constant 0 : index
    %c0_8 = arith.constant 0 : index
    %7 = vector.load %arg5[%c0_7, %c0_8] : memref<32x24xf32, #tpu.memory_space<vmem>>, vector<32x24xf32>
    %c0_9 = arith.constant 0 : index
    %c0_10 = arith.constant 0 : index
    %c0_11 = arith.constant 0 : index
    %8 = vector.load %arg3[%c0_9, %c0_10, %c0_11] : memref<1x24x256xf32, #tpu.memory_space<vmem>>, vector<1x24x256xf32>
    %9 = vector.shape_cast %8 : vector<1x24x256xf32> to vector<24x256xf32>
    %cst_12 = arith.constant dense<0.000000e+00> : vector<32x256xf32>
    %10 = tpu.matmul %7, %9, %cst_12 {dimension_numbers = #tpu.dot_dimension_numbers<[1], [0], [0], [1], [0, 0, 1, 1], [], []>} : vector<32x24xf32>, vector<24x256xf32>, vector<32x256xf32> -> vector<32x256xf32>
    %c0_13 = arith.constant 0 : index
    %c0_14 = arith.constant 0 : index
    %c0_15 = arith.constant 0 : index
    %11 = vector.load %arg7[%c0_13, %c0_14, %c0_15] : memref<1x32x256xf32, #tpu.memory_space<vmem>>, vector<1x32x256xf32>
    %12 = vector.shape_cast %11 : vector<1x32x256xf32> to vector<32x256xf32>
    %13 = vector.shape_cast %10 : vector<32x256xf32> to vector<1x32x256xf32>
    tpu.vector_store %arg7[%c0_13, %c0_14, %c0_15], %13 {strides = array<i32>} : memref<1x32x256xf32, #tpu.memory_space<vmem>>, vector<1x32x256xf32>,
    return
  }
  func.func @transform_0(%arg0: i32, %arg1: i32) -> (i32, i32, i32) {
    %c0_i32 = arith.constant 0 : i32
    %c0_i32_0 = arith.constant 0 : i32
    return %arg0, %c0_i32, %arg1 : i32, i32, i32
  }
  func.func @transform_1(%arg0: i32, %arg1: i32) -> (i32, i32, i32) {
    %c0_i32 = arith.constant 0 : i32
    %c0_i32_0 = arith.constant 0 : i32
    return %arg0, %c0_i32, %arg1 : i32, i32, i32
  }
  func.func @transform_2(%arg0: i32, %arg1: i32) -> (i32, i32) {
    %c0_i32 = arith.constant 0 : i32
    %c0_i32_0 = arith.constant 0 : i32
    %c0_i32_1 = arith.constant 0 : i32
    return %c0_i32, %c0_i32_0 : i32, i32
  }
  func.func @transform_3(%arg0: i32, %arg1: i32) -> (i32, i32) {
    %c0_i32 = arith.constant 0 : i32
    %c0_i32_0 = arith.constant 0 : i32
    %c0_i32_1 = arith.constant 0 : i32
    return %c0_i32, %c0_i32_0 : i32, i32
  }
  func.func @transform_4(%arg0: i32, %arg1: i32) -> (i32, i32, i32) {
    %c0_i32 = arith.constant 0 : i32
    %c0_i32_0 = arith.constant 0 : i32
    return %arg0, %c0_i32, %arg1 : i32, i32, i32
  }
  func.func @transform_5(%arg0: i32, %arg1: i32) -> (i32, i32, i32) {
    %c0_i32 = arith.constant 0 : i32
    %c0_i32_0 = arith.constant 0 : i32
    return %arg0, %c0_i32, %arg1 : i32, i32, i32
  }
}

</mosaic_0001>

<bundles_post_ra>
// kernel: tpu_custom_call.1
= control target key start
LH: loop header
LB: loop body
LE: loop exit
PB: predicated region body
PF: predicated region fallthrough
CT: control target
= control target key end

     0   :  { %11 = vsyncpa [#allocation3], 0  ;;  %s1252_s0 = inlined_call_operand.hbm [shape: f32[2,16,256], index: 0, kind: input, shape index: {}]   ;;  %s1253_s1 = inlined_call_operand.vmem [shape: f32[2,24,256], index: 1, kind: input, shape index: {}]   ;;  %s1254_s2 = inlined_call_operand.vmem [shape: f32[32,16], index: 2, kind: input, shape index: {}]   ;;  %s1255_s3 = inlined_call_operand.vmem [shape: f32[32,24], index: 3, kind: input, shape index: {}]   ;;  %s1256_s4 = inlined_call_operand.hbm [shape: f32[2,32,256], index: 4, kind: output, shape index: {0}]   ;;  %s1257_s5 = inlined_call_operand.hbm [shape: f32[2,32,256], index: 5, kind: output, shape index: {1}]  }
   0x1   :  { %13 = vsyncpa [#allocation3 + $0x1], 0 }
   0x2   :  { %14 = vsyncpa [#allocation4], 0 }
   0x3   :  { %16 = vsyncpa [#allocation4 + $0x1], 0 }
   0x4   :  { %17 = vsyncpa [#allocation7], 0 }
   0x5   :  { %19 = vsyncpa [#allocation7 + $0x1], 0  ;;  %s1012_s18 = smov 0   ;;  %s1014_s19 = smov 0  }
   0x6   :  { %s1016_s20 = smov 0   ;;  %s1018_s21 = smov 0  }
   0x7   :  { %s1020_s22 = smov 0   ;;  %s1022_s23 = smov 0  }
   0x8 LB: > { %s730_s24 = sadd.s32 4294967295, %s972_s23   ;;  %s731_s25 = sadd.s32 4294967294, %s972_s23   ;;  %s972_s23 = sphi %s1022_s23, %s25_s23   ;;  %s968_s22 = sphi %s1020_s22, %s1268_s22   ;;  %s964_s21 = sphi %s1018_s21, %s1267_s21   ;;  %s960_s20 = sphi %s1016_s20, %s1266_s20   ;;  %s956_s19 = sphi %s1014_s19, %s1265_s19   ;;  %s952_s18 = sphi %s1012_s18, %s1264_s18  }
   0x9   : > { %s37_s26 = sadd.s32 1, %s968_s22  ;;  %s46_s27 = sadd.s32 1, %s960_s20 }
   0xa   : > { %p39_p0 = scmp.ge.s32.totalorder %s37_s26, 2  ;;  %p53_p1 = scmp.ne.s32.totalorder %s960_s20, %s956_s19 }
   0xb   : > { %p54_p2 = scmp.eq.s32.totalorder %s972_s23, 0  ;;  %p59_p3 = scmp.ne.s32.totalorder %s956_s19, %s952_s18 }
   0xc   : > { %s1270_s26 = smov (%p39_p0, %s37_s26), 0  ;;  %p60_p5 = scmp.eq.s32.totalorder %s730_s24, 0 }
   0xd   : > { %p1053_p4 = por %p54_p2, %p53_p1  ;;  %s41_s29 = ssub.s32 %s968_s22, %s1270_s26 }
   0xe   : > { %p155_p6 = scmp.eq.s32.totalorder %s730_s24, 1  ;;  %p44_p7 = scmp.eq.s32.totalorder %s41_s29, 0 }
   0xf   : > { %p1059_p8 = por %p60_p5, %p59_p3  ;;  %p161_p10 = scmp.eq.s32.totalorder %s731_s25, 1 }
  0x10   : > { %p1063_p9 = por %p155_p6, %p53_p1  ;;  %p779_p13 = scmp.lt.s32.totalorder %s972_s23, 2 }
  0x11   : > { %s1068_s7 = scalar_select %p44_p7, %s960_s20, %s46_s27  }
  0x12   : > { %p1070_p11 = por %p161_p10, %p59_p3  ;;  %s215_s9 = sand.u32 1, %s960_s20  }
  0x13   : > { %s734_s10 = sshll.u32 %s215_s9, 5  ;;  %s758_s11 = sshll.u32 %s968_s22, 9 }
  0x14   : > { %s227_s14 = scalar_lea.hbm %s1252_s0, %s758_s11  ;;  %s219_s15 = scalar_lea.vmem [#allocation2], %s734_s10 }
  0x15   : > { %s228_s16 = sshll.u32 %s219_s15, 4  ;;  %p1083_p0 = pnand %p779_p13, %p1053_p4  ;;  %s229_s16 = int_to_ptr.vmem [resolvable:$true] %s228_s16 }
  0x16   : > { %p737_p1 = scmp.ge.s32.totalorder %s972_s23, 1  ;;  %s216_s24 = scalar_lea.sflag [#allocation3], %s215_s9 }
  0x17   : > { %p836_p2 = pneg %p1083_p0  ;;  %s847_s25 = scalar_lea.vmem %s229_s16, 512 }
  0x18   : > { %p848_p3 = scmp.ne.s32.totalorder %s229_s16, %s847_s25  ;;  %s974_s27 = smov [#allocation2]  }
  0x19   : > { %s852_s29 = sshll.u32 %s974_s27, 4  ;;  %s853_s29 = int_to_ptr.vmem [resolvable:$false] %s852_s29 }
  0x1a   : > { %p850_p5 = pnand %p848_p3, %p836_p2  ;;  %s854_s10 = scalar_lea.vmem %s853_s29, 1024 }
  0x1b   : > { %p855_p7 = scmp.lt.s32.totalorder %s229_s16, %s853_s29  ;;  %p856_p10 = scmp.lt.s32.totalorder %s854_s10, %s847_s25 }
  0x1c   : > { %p851_p6 = pneg %p850_p5 }
  0x1d   : > { %p857_p12 = por %p856_p10, %p855_p7 }
  0x1f   : > { %p858_p4 = pnand %p857_p12, %p851_p6 }
  0x21   : > { %861 = shalt.err (!%p858_p4)
}
  0x22   : > { %s975_s28 = smov 256   ;;  %s976_s9 = smov 16  }
  0x23   : > { %771 = dma.hbm_to_vmem [thread:$0]  (!%p1083_p0), %s227_s14, 512, %s229_s16, %s216_s24, %s975_s28, %s975_s28, %s976_s9  }
  0x24   : > { %p249_p13 = scmp.lt.s32.totalorder %s972_s23, 3 }
  0x26   : > { %p250_p2 = pnand %p737_p1, %p249_p13 }
  0x27   : > { %s1096_s11 = sand.u32 (!%p250_p2), 1, %s956_s19  }
  0x28   : > { %253 = sbr.rel (%p250_p2) target bundleno = 302 (0x12e), region = 36  ;;  %s738_s12 = sshll.u32 (!%p250_p2), %s1096_s11, 5 }
  0x29   : > { %s256_s13 = scalar_lea.sflag (!%p250_p2), [#allocation3], %s1096_s11  ;;  %s259_s15 = scalar_lea.vmem (!%p250_p2), [#allocation2], %s738_s12 }
  0x2d   : > { %939 = dma.done.wait (%p1059_p8), %s256_s13, 512  }
  0x2e   : > { %941 = vsyncadd (%p1059_p8), %s256_s13, 4294966784  ;;  %p302_p12 = scmp.lt.s32.totalorder %s964_s21, 1  ;;  %v977_v0 = vmov 0.0   ;;  %v320_v1 = vld [vmem:[%s259_s15 + $0x18] sm:$0xff]  ;;  %v319_v3 = vld [vmem:[%s259_s15 + $0x10] sm:$0xff]  ;;  %vm321_vm0 = vcmask 130048  }
  0x2f   : > { %398 = vmatprep.mubr.f32.mxu0 %v977_v0  ;;  %518 = vmatprep.mubr.f32.mxu1 %v977_v0  ;;  %v318_v5 = vld [vmem:[%s259_s15 + $0x8] sm:$0xff]  ;;  %v317_v7 = vld [vmem:[%s259_s15] sm:$0xff]  ;;  %vm441_vm1 = vcmask 195584   ;;  %v315_v15 = vld [vmem:[%s1254_s2 + $0x10] sm:$0xff]  ;;  %s739_s29 = sshll.u32 %s1096_s11, 6  ;;  %s759_s12 = sshll.u32 %s964_s21, 10 }
  0x30   : > { %s303_s14 = scalar_select %p302_p12, %s964_s21, 1  ;;  %362 = vmatprep.subr.mxu0 %v320_v1  ;;  %v313_v9 = vld [vmem:[%s1254_s2] sm:$0xff]  ;;  %v314_v13 = vld [vmem:[%s1254_s2 + $0x8] sm:$0xff]  ;;  %v433_v16 = vld [vmem:[%s1255_s3 + $0x10] sm:$0xff] }
  0x31   : > { %363 = vmatpush1.msra.mxu0 %v319_v3  ;;  %v431_v12 = vld [vmem:[%s1255_s3] sm:$0xff]  ;;  %v432_v14 = vld [vmem:[%s1255_s3 + $0x8] sm:$0xff]  ;;  %v316_v17 = vld [vmem:[%s1254_s2 + $0x18] sm:$0xff]  ;;  %s1142_s10 = scalar_lea.vmem [#allocation5], %s739_s29  ;;  %s1146_s28 = scalar_lea.vmem [#allocation6], %s739_s29 }
  0x32   : > { %s761_s16 = smul.u32 48, %s303_s14  ;;  %364 = vmatprep.subr.mxu0 %v318_v5  ;;  %v434_v18 = vld [vmem:[%s1255_s3 + $0x18] sm:$0xff]  ;;  %s572_s9 = sshll.u32 %s1142_s10, 4  ;;  %s1157_s9 = int_to_ptr.vmem [resolvable:$true] %s572_s9 }
  0x33   : > { %365 = vmatpush1.msra.mxu0 %v317_v7  ;;  %s590_s13 = sshll.u32 %s1146_s28, 4  ;;  %s1176_s24 = scalar_lea.hbm %s1257_s5, %s759_s12  ;;  %s1169_s13 = int_to_ptr.vmem [resolvable:$true] %s590_s13 }
  0x34   : > { %s309_s25 = scalar_lea.vmem %s1253_s1, %s761_s16  ;;  %742 = vmatmul.mubr.msk.f32.vlgmr.msra.gmra.mxu0 %vm321_vm0, %v313_v9  ;;  %s1165_s16 = scalar_lea.hbm %s1256_s4, %s759_s12 }
  0x35   : > { %v440_v2 = vld [vmem:[%s309_s25 + $0x28] sm:$0xff]  ;;  %v439_v4 = vld [vmem:[%s309_s25 + $0x20] sm:$0xff]  ;;  %v438_v6 = vld [vmem:[%s309_s25 + $0x18] sm:$0xff]  ;;  %404 = vmatprep.mubr.f32.mxu0 %v977_v0  ;;  %s862_s30 = scalar_lea.vmem %s1157_s9, 1024  ;;  %s978_s27 = smov [#allocation5]  }
  0x36   : > { %480 = vmatprep.subr.mxu1 %v440_v2  ;;  %v437_v8 = vld [vmem:[%s309_s25 + $0x10] sm:$0xff]  ;;  %v436_v10 = vld [vmem:[%s309_s25 + $0x8] sm:$0xff]  ;;  %v435_v11 = vld [vmem:[%s309_s25] sm:$0xff]  ;;  %s552_s25 = scalar_lea.sflag [#allocation4], %s1096_s11  ;;  %p863_p8 = scmp.ne.s32.totalorder %s1157_s9, %s862_s30 }
  0x37   : > { %481 = vmatpush1.msra.mxu1 %v439_v4  ;;  %s866_s29 = sshll.u32 %s978_s27, 4  ;;  %s867_s29 = int_to_ptr.vmem [resolvable:$false] %s866_s29 }
  0x38   : > { %482 = vmatprep.subr.mxu1 %v438_v6  ;;  %743 = vmatmul.mubr.msk.f32.gmra.mxu0 %vm321_vm0, %v314_v13  ;;  %p864_p0 = pnand %p863_p8, %p1063_p9  ;;  %s868_s15 = scalar_lea.vmem %s867_s29, 2048 }
  0x39   : > { %483 = vmatpush1.msra.mxu1 %v437_v8  ;;  %410 = vmatprep.mubr.f32.mxu0 %v977_v0  ;;  %p869_p3 = scmp.lt.s32.totalorder %s1157_s9, %s867_s29  ;;  %p870_p5 = scmp.lt.s32.totalorder %s868_s15, %s862_s30 }
  0x3a   : > { %484 = vmatprep.subr.mxu1 %v436_v10  ;;  %p865_p1 = pneg %p864_p0 }
  0x3b   : > { %485 = vmatpush1.msra.mxu1 %v435_v11  ;;  %p871_p6 = por %p870_p5, %p869_p3 }
  0x3c   : > { %746 = vmatmul.mubr.msk.f32.vlgmr.msra.gmra.mxu1 %vm441_vm1, %v431_v12  ;;  %744 = vmatmul.mubr.msk.f32.gmra.mxu0 %vm321_vm0, %v315_v15 }
  0x3d   : > { %524 = vmatprep.mubr.f32.mxu1 %v977_v0  ;;  %416 = vmatprep.mubr.f32.mxu0 %v977_v0  ;;  %p872_p7 = pnand %p871_p6, %p865_p1 }
  0x40   : > { %747 = vmatmul.mubr.msk.f32.gmra.mxu1 %vm441_vm1, %v432_v14  ;;  %745 = vmatmul.mubr.msk.f32.gmra.mxu0 %vm321_vm0, %v316_v17 }
  0x41   : > { %530 = vmatprep.mubr.f32.mxu1 %v977_v0 }
  0x44   : > { %748 = vmatmul.mubr.msk.f32.gmra.mxu1 %vm441_vm1, %v433_v16 }
  0x45   : > { %536 = vmatprep.mubr.f32.mxu1 %v977_v0 }
  0x48   : > { %749 = vmatmul.mubr.msk.f32.gmra.mxu1 %vm441_vm1, %v434_v18 }
  0xf4   : > { %v400_v19 = vpop.f32.mrf.mxu0 }
  0xf5   : > { %423 = vst [vmem:[%s1142_s10] sm:$0xff] %v400_v19 }
  0xf6   : > { %v402_v20 = vpop.f32.mrf.mxu0 }
  0xf7   : > { %424 = vst [vmem:[%s1142_s10 + $0x8] sm:$0xff] %v402_v20 }
  0xf8   : > { %v406_v22 = vpop.f32.mrf.mxu0 }
  0xf9   : > { %425 = vst [vmem:[%s1142_s10 + $0x10] sm:$0xff] %v406_v22 }
  0xfa   : > { %v408_v24 = vpop.f32.mrf.mxu0 }
  0xfb   : > { %426 = vst [vmem:[%s1142_s10 + $0x18] sm:$0xff] %v408_v24 }
  0xfc   : > { %v520_v21 = vpop.f32.mrf.mxu1  ;;  %v412_v26 = vpop.f32.mrf.mxu0 }
  0xfd   : > { %543 = vst [vmem:[%s1146_s28] sm:$0xff] %v520_v21  ;;  %427 = vst [vmem:[%s1142_s10 + $0x20] sm:$0xff] %v412_v26 }
  0xfe   : > { %v522_v23 = vpop.f32.mrf.mxu1  ;;  %v414_v28 = vpop.f32.mrf.mxu0 }
  0xff   : > { %544 = vst [vmem:[%s1146_s28 + $0x8] sm:$0xff] %v522_v23  ;;  %428 = vst [vmem:[%s1142_s10 + $0x28] sm:$0xff] %v414_v28 }
 0x100   : > { %v526_v25 = vpop.f32.mrf.mxu1  ;;  %v418_v30 = vpop.f32.mrf.mxu0 }
 0x101   : > { %545 = vst [vmem:[%s1146_s28 + $0x10] sm:$0xff] %v526_v25  ;;  %429 = vst [vmem:[%s1142_s10 + $0x30] sm:$0xff] %v418_v30 }
 0x102   : > { %v528_v27 = vpop.f32.mrf.mxu1  ;;  %v420_v32 = vpop.f32.mrf.mxu0 }
 0x103   : > { %546 = vst [vmem:[%s1146_s28 + $0x18] sm:$0xff] %v528_v27  ;;  %430 = vst [vmem:[%s1142_s10 + $0x38] sm:$0xff] %v420_v32 }
 0x104   : > { %v532_v29 = vpop.f32.mrf.mxu1 }
 0x105   : > { %547 = vst [vmem:[%s1146_s28 + $0x20] sm:$0xff] %v532_v29 }
 0x106   : > { %v534_v31 = vpop.f32.mrf.mxu1 }
 0x107   : > { %548 = vst [vmem:[%s1146_s28 + $0x28] sm:$0xff] %v534_v31 }
 0x108   : > { %v538_v33 = vpop.f32.mrf.mxu1 }
 0x109   : > { %549 = vst [vmem:[%s1146_s28 + $0x30] sm:$0xff] %v538_v33 }
 0x10a   : > { %v540_v34 = vpop.f32.mrf.mxu1 }
 0x10b   : > { %875 = shalt.err (!%p872_p7)
}
 0x10c   : > { %s876_s10 = scalar_lea.hbm %s1165_s16, 1024  ;;  %s880_s21 = scalar_lea.hbm %s1256_s4, 2048 }
 0x10d   : > { %p877_p10 = scmp.ne.s32.totalorder %s1165_s16, %s876_s10  ;;  %p881_p2 = scmp.lt.s32.totalorder %s1165_s16, %s1256_s4 }
 0x10e   : > { %p882_p12 = scmp.lt.s32.totalorder %s880_s21, %s876_s10 }
 0x10f   : > { %p878_p4 = pnand %p877_p10, %p1063_p9 }
 0x110   : > { %p883_p8 = por %p882_p12, %p881_p2 }
 0x111   : > { %p879_p13 = pneg %p878_p4 }
 0x113   : > { %p884_p0 = pnand %p883_p8, %p879_p13 }
 0x115   : > { %887 = shalt.err (!%p884_p0)
}
 0x116   : > { %s979_s30 = smov 256   ;;  %s980_s29 = smov 16   ;;  %550 = vst [vmem:[%s1146_s28 + $0x38] sm:$0xff] %v540_v34 }
 0x117   : > { %764 = dma.vmem_to_hbm [thread:$0]  (%p1063_p9), %s1157_s9, 1024, %s1165_s16, %s552_s25, %s979_s30, %s979_s30, %s980_s29  }
 0x118   : > { %s557_s15 = scalar_lea.sflag [#allocation7], %s1096_s11  ;;  %s888_s10 = scalar_lea.vmem %s1169_s13, 1024 }
 0x119   : > { %p889_p1 = scmp.ne.s32.totalorder %s1169_s13, %s888_s10  ;;  %s981_s12 = smov [#allocation6]  }
 0x11a   : > { %s892_s14 = sshll.u32 %s981_s12, 4  ;;  %s893_s14 = int_to_ptr.vmem [resolvable:$false] %s892_s14 }
 0x11b   : > { %p890_p3 = pnand %p889_p1, %p1063_p9  ;;  %s894_s21 = scalar_lea.vmem %s893_s14, 2048 }
 0x11c   : > { %p895_p6 = scmp.lt.s32.totalorder %s1169_s13, %s893_s14  ;;  %p896_p7 = scmp.lt.s32.totalorder %s894_s21, %s888_s10 }
 0x11d   : > { %p891_p5 = pneg %p890_p3 }
 0x11e   : > { %p897_p10 = por %p896_p7, %p895_p6 }
 0x120   : > { %p898_p4 = pnand %p897_p10, %p891_p5 }
 0x122   : > { %901 = shalt.err (!%p898_p4)
}
 0x123   : > { %s902_s28 = scalar_lea.hbm %s1176_s24, 1024  ;;  %s906_s16 = scalar_lea.hbm %s1257_s5, 2048 }
 0x124   : > { %p903_p13 = scmp.ne.s32.totalorder %s1176_s24, %s902_s28  ;;  %p907_p8 = scmp.lt.s32.totalorder %s1176_s24, %s1257_s5 }
 0x125   : > { %p908_p0 = scmp.lt.s32.totalorder %s906_s16, %s902_s28 }
 0x126   : > { %p904_p2 = pnand %p903_p13, %p1063_p9 }
 0x127   : > { %p909_p1 = por %p908_p0, %p907_p8 }
 0x128   : > { %p905_p12 = pneg %p904_p2 }
 0x12a   : > { %p910_p3 = pnand %p909_p1, %p905_p12 }
 0x12c   : > { %913 = shalt.err (!%p910_p3)
}
 0x12d   : > { %765 = dma.vmem_to_hbm [thread:$0]  (%p1063_p9), %s1169_s13, 1024, %s1176_s24, %s557_s15, %s979_s30, %s979_s30, %s980_s29  }
 0x12e PF: > { %s605_s27 = sand.u32 1, %s952_s18   ;;  %p1263_p5 = scmp.ge.s32.totalorder %s972_s23, 2 }
 0x12f   : > { %s606_s10 = scalar_lea.sflag [#allocation4], %s605_s27 }
 0x130   : > { %p773_p6 = pnand %p1263_p5, %p1070_p11 }
 0x132   : > { %p774_p7 = pneg %p773_p6 }
 0x134   : > { %943 = dma.done.wait (%p774_p7), %s606_s10, 1024  }
 0x135   : > { %945 = vsyncadd (%p774_p7), %s606_s10, 4294966272  ;;  %s615_s12 = scalar_lea.sflag [#allocation7], %s605_s27 }
 0x136   : > { %947 = dma.done.wait (%p774_p7), %s615_s12, 1024  }
 0x137   : > { %949 = vsyncadd (%p774_p7), %s615_s12, 4294966272  ;;  %s25_s23 = sadd.s32 1, %s972_s23   ;;  %s1264_s18 = smov %s956_s19 }
 0x138   : > { %p22_p10 = scmp.ge.s32.totalorder %s25_s23, 4   ;;  %s1265_s19 = smov %s960_s20 }
 0x139   : > { %s1266_s20 = smov %s1068_s7  ;;  %s1267_s21 = smov %s968_s22 }
 0x13a   : > { %s1268_s22 = smov %s1270_s26  ;;  %24 = sbr.rel (!%p22_p10) target bundleno = 8 (0x8), region = 101 }
 0x13f   :  { %620 = vsyncpa [#allocation3], 1 }
 0x140   :  { %622 = vsyncpa [#allocation3 + $0x1], 1 }
 0x141   :  { %623 = vsyncpa [#allocation4], 1 }
 0x142   :  { %625 = vsyncpa [#allocation4 + $0x1], 1 }
 0x143   :  { %626 = vsyncpa [#allocation7], 1 }
 0x144   :  { %628 = vsyncpa [#allocation7 + $0x1], 1 }

</bundles_post_ra>
